<compile_context>
chip_gen: v5e
topology: v5e:2x2
jax: 0.10.0
libtpu: 0.0.40
codegen_flags: <defaults>
</compile_context>

<pallas_src>
import functools

import jax
import jax.numpy as jnp
from jax.experimental import pallas as pl
from jax.experimental.pallas import tpu as pltpu


# ---------------------------------------------------------------------------
# Pallas kernel (channel-major blocks: (C, tile_s))
# ---------------------------------------------------------------------------
def _attn_gate_kernel(g_ref, x_ref, wg_ref, wx_ref, bh_ref, wp_ref, bp_ref,
                      out_ref, *, f_int, small_channels):
    g = g_ref[...].astype(jnp.float32)          # (F_g, T) channels x spatial
    x = x_ref[...].astype(jnp.float32)          # (F_l, T)

    if small_channels:
        # VPU path.  wg: (F_g, F_int), wx: (F_l, F_int), bh: (1, F_int), wp: (F_int, 1)
        wg = wg_ref[...]
        wx = wx_ref[...]
        bh = bh_ref[...]
        wp = wp_ref[...]
        acc = None
        for j in range(f_int):                  # unrolled: f_int is small & static
            g1 = jnp.sum(wg[:, j:j + 1] * g, axis=0, keepdims=True)   # (1, T)
            x1 = jnp.sum(wx[:, j:j + 1] * x, axis=0, keepdims=True)   # (1, T)
            h = jnp.maximum(g1 + x1 + bh[:, j:j + 1], 0.0)            # (1, T)
            t = wp[j:j + 1, :] * h                                    # (1, T)
            acc = t if acc is None else acc + t
        logit = acc + bp_ref[...]                                     # (1, T)
    else:
        # MXU path (channel-major, lane-dense N).  wg: (F_int, F_g), wx: (F_int, F_l),
        # bh: (F_int, 1), wp: (F_int, 1)
        g1 = jax.lax.dot_general(wg_ref[...], g, (((1,), (0,)), ((), ())),
                                 preferred_element_type=jnp.float32)  # (F_int, T)
        x1 = jax.lax.dot_general(wx_ref[...], x, (((1,), (0,)), ((), ())),
                                 preferred_element_type=jnp.float32)  # (F_int, T)
        h = jnp.maximum(g1 + x1 + bh_ref[...], 0.0)                   # (F_int, T)
        # Width-1 psi projection: VPU multiply + sublane reduce (no N=1 MXU matmul).
        logit = jnp.sum(h * wp_ref[...], axis=0, keepdims=True) + bp_ref[...]

    psi = jax.nn.sigmoid(logit)                                       # (1, T)
    out_ref[...] = (x * psi).astype(out_ref.dtype)                    # (F_l, T), lane-dense store


def _attn_gate_channel_major(g3, x3, wg, wx, bh, wp, bp, *, f_int,
                             small_channels, tile_s):
    """g3: (B, F_g, S), x3: (B, F_l, S); returns (B, F_l, S)."""
    B, f_g, S = g3.shape
    f_l = x3.shape[1]
    grid_s = pl.cdiv(S, tile_s)   # partial last block handled by Pallas (masked writes)

    kernel = functools.partial(_attn_gate_kernel, f_int=f_int,
                               small_channels=small_channels)
    return pl.pallas_call(
        kernel,
        out_shape=jax.ShapeDtypeStruct((B, f_l, S), x3.dtype),
        grid_spec=pltpu.PrefetchScalarGridSpec(
            num_scalar_prefetch=0,
            grid=(B, grid_s),
            in_specs=[
                pl.BlockSpec((None, f_g, tile_s), lambda b, i: (b, 0, i)),  # g tile
                pl.BlockSpec((None, f_l, tile_s), lambda b, i: (b, 0, i)),  # x tile
                pl.BlockSpec(wg.shape, lambda b, i: (0, 0)),                # Wg (folded BN)
                pl.BlockSpec(wx.shape, lambda b, i: (0, 0)),                # Wx (folded BN)
                pl.BlockSpec(bh.shape, lambda b, i: (0, 0)),                # bg + bx
                pl.BlockSpec(wp.shape, lambda b, i: (0, 0)),                # w_psi
                pl.BlockSpec(bp.shape, lambda b, i: (0, 0)),                # b_psi
            ],
            out_specs=pl.BlockSpec((None, f_l, tile_s), lambda b, i: (b, 0, i)),
        ),
        compiler_params=pltpu.CompilerParams(
            dimension_semantics=("parallel", "parallel")),
    )(g3, x3, wg, wx, bh, wp, bp)


# ---------------------------------------------------------------------------
# Parameter construction (deterministic) + BN folding (inference mode)
# ---------------------------------------------------------------------------
def _fold_conv_bn(w, b, gamma, beta, mean, var, eps=1e-5):
    """Fold eval-mode BatchNorm into a 1x1x1 conv.

    w: (Cout, Cin) conv weight, b: (Cout,) conv bias.
    Returns (Cin, Cout) weight (for x @ W form) and (1, Cout) bias.
    """
    scale = gamma / jnp.sqrt(var + eps)                 # (Cout,)
    w_eff = (w * scale[:, None]).T                      # (Cin, Cout)
    b_eff = (b - mean) * scale + beta                   # (Cout,)
    return w_eff.astype(jnp.float32), b_eff[None, :].astype(jnp.float32)


def make_params(key, F_g, F_l, F_int):
    ks = jax.random.split(key, 12)
    wg_conv = jax.random.normal(ks[0], (F_int, F_g), jnp.float32) * 0.1
    bg_conv = jax.random.normal(ks[1], (F_int,), jnp.float32) * 0.1
    wx_conv = jax.random.normal(ks[2], (F_int, F_l), jnp.float32) * 0.1
    bx_conv = jax.random.normal(ks[3], (F_int,), jnp.float32) * 0.1
    wp_conv = jax.random.normal(ks[4], (1, F_int), jnp.float32) * 0.1
    bp_conv = jax.random.normal(ks[5], (1,), jnp.float32) * 0.1

    def bn(kw, kb, c):
        gamma = 1.0 + 0.1 * jax.random.normal(kw, (c,), jnp.float32)
        beta = 0.1 * jax.random.normal(kb, (c,), jnp.float32)
        mean = 0.05 * jnp.arange(c, dtype=jnp.float32)
        var = jnp.ones((c,), jnp.float32) * 1.5
        return gamma, beta, mean, var

    wg, bg = _fold_conv_bn(wg_conv, bg_conv, *bn(ks[6], ks[7], F_int))
    wx, bx = _fold_conv_bn(wx_conv, bx_conv, *bn(ks[8], ks[9], F_int))
    wp, bp = _fold_conv_bn(wp_conv, bp_conv, *bn(ks[10], ks[11], 1))
    # wg: (F_g, F_int), bg: (1, F_int), wx: (F_l, F_int), bx: (1, F_int),
    # wp: (F_int, 1),   bp: (1, 1)
    return dict(wg=wg, bg=bg, wx=wx, bx=bx, wp=wp, bp=bp)


# ---------------------------------------------------------------------------
# Public wrapper: NCDHW in, NCDHW out (matching the PyTorch module).
# ---------------------------------------------------------------------------
@functools.partial(jax.jit, static_argnames=("tile_s_target",))
def attention_3dblock(g, x, params, *, tile_s_target=8192):
    # g: (B, F_g, D, H, W),  x: (B, F_l, D, H, W)
    B, F_g = g.shape[0], g.shape[1]
    F_l = x.shape[1]
    S = 1
    for d in g.shape[2:]:
        S *= d
    F_int = params["wg"].shape[1]

    # Channel-major flattening: pure reshape, no transposes, no padding copies.
    g3 = g.reshape(B, F_g, S)
    x3 = x.reshape(B, F_l, S)

    # Spatial tile: as large as a conservative VMEM budget allows (double-buffered
    # f32 g/x inputs + output), lane-aligned to 128; use the full S if it fits.
    bytes_per_pos = (F_g + 2 * F_l) * 4 * 2
    vmem_budget = 24 * 1024 * 1024   # stays under the 32 MiB scoped default on all gens
    cap = max(128, (vmem_budget // bytes_per_pos) // 128 * 128)
    target = min(tile_s_target, cap)
    tile_s = S if S <= target else max(128, (target // 128) * 128)

    small_channels = max(F_g, F_l, F_int) <= 32
    bh = params["bg"] + params["bx"]                        # (1, F_int): biases add pre-ReLU
    if small_channels:
        wg_op, wx_op, bh_op = params["wg"], params["wx"], bh
    else:
        wg_op, wx_op, bh_op = params["wg"].T, params["wx"].T, bh.T

    out3 = _attn_gate_channel_major(
        g3, x3, wg_op, wx_op, bh_op, params["wp"], params["bp"],
        f_int=F_int, small_channels=small_channels, tile_s=tile_s)
    return out3.reshape(x.shape)


# ---------------------------------------------------------------------------
# Pure-JAX reference of the same (BN-folded) computation.
# ---------------------------------------------------------------------------
def _reference(g, x, p):
    B, F_g = g.shape[0], g.shape[1]
    F_l = x.shape[1]
    S = g.size // (B * F_g)
    hi = jax.lax.Precision.HIGHEST
    g3 = g.reshape(B, F_g, S)
    x3 = x.reshape(B, F_l, S)
    g1 = jnp.einsum("cf,bcs->bfs", p["wg"], g3, precision=hi) + p["bg"].reshape(1, -1, 1)
    x1 = jnp.einsum("cf,bcs->bfs", p["wx"], x3, precision=hi) + p["bx"].reshape(1, -1, 1)
    h = jnp.maximum(g1 + x1, 0.0)
    logit = jnp.einsum("fo,bfs->bos", p["wp"], h, precision=hi) + p["bp"].reshape(1, 1, 1)
    psi = jax.nn.sigmoid(logit)                              # (B, 1, S)
    return (x3 * psi).reshape(x.shape)


if __name__ == "__main__":
    key = jax.random.PRNGKey(0)
    k_g, k_x, k_p, k_g2, k_x2, k_p2 = jax.random.split(key, 6)

    # --- Test 1: small channel counts -> VPU (broadcast-FMA) path. ---
    B, F_g, F_l, F_int, D, H, W = 2, 4, 4, 8, 4, 8, 8        # S = 256 positions / batch
    g = jax.random.normal(k_g, (B, F_g, D, H, W), jnp.float32)
    x = jax.random.normal(k_x, (B, F_l, D, H, W), jnp.float32)
    params = make_params(k_p, F_g, F_l, F_int)

    out = jax.block_until_ready(attention_3dblock(g, x, params))
    ref = _reference(g, x, params)
    assert out.shape == x.shape
    assert jnp.allclose(out, ref, atol=1e-5, rtol=1e-5), "VPU path mismatch vs reference"

    # --- Test 2: larger channel counts -> channel-major MXU path. ---
    B2, Fg2, Fl2, Fi2, D2, H2, W2 = 2, 64, 64, 48, 2, 4, 16  # S = 128
    g2 = jax.random.normal(k_g2, (B2, Fg2, D2, H2, W2), jnp.float32)
    x2 = jax.random.normal(k_x2, (B2, Fl2, D2, H2, W2), jnp.float32)
    params2 = make_params(k_p2, Fg2, Fl2, Fi2)

    out2 = jax.block_until_ready(attention_3dblock(g2, x2, params2))
    ref2 = _reference(g2, x2, params2)
    assert out2.shape == x2.shape
    # Looser tolerance: in-kernel f32 MXU matmuls may use bf16-pass arithmetic.
    assert jnp.allclose(out2, ref2, atol=2e-2, rtol=2e-2), "MXU path mismatch vs reference"

    print("KERNEL_OK")
</pallas_src>

<mosaic_0001>
module attributes {stable_mosaic.version = 11 : i64} {
  func.func @_attn_gate_kernel(%arg0: i32, %arg1: i32, %arg2: memref<1x4x256xf32, #tpu.memory_space<vmem>>, %arg3: memref<1x4x256xf32, #tpu.memory_space<vmem>>, %arg4: memref<4x8xf32, #tpu.memory_space<vmem>>, %arg5: memref<4x8xf32, #tpu.memory_space<vmem>>, %arg6: memref<1x8xf32, #tpu.memory_space<vmem>>, %arg7: memref<8x1xf32, #tpu.memory_space<vmem>>, %arg8: memref<1x1xf32, #tpu.memory_space<vmem>>, %arg9: memref<1x4x256xf32, #tpu.memory_space<vmem>>) attributes {dimension_semantics = [#tpu.dimension_semantics<parallel>, #tpu.dimension_semantics<parallel>], iteration_bounds = array<i64: 2, 1>, scalar_prefetch = 0 : i64, scratch_operands = 0 : i64, tpu.core_type = #tpu.core_type<tc>, window_params = [{transform_indices = @transform_0, window_bounds = array<i64: 1, 4, 256>}, {transform_indices = @transform_1, window_bounds = array<i64: 1, 4, 256>}, {pipeline_mode = #tpu.pipeline_mode<synchronous>, transform_indices = @transform_2, window_bounds = array<i64: 4, 8>}, {pipeline_mode = #tpu.pipeline_mode<synchronous>, transform_indices = @transform_3, window_bounds = array<i64: 4, 8>}, {pipeline_mode = #tpu.pipeline_mode<synchronous>, transform_indices = @transform_4, window_bounds = array<i64: 1, 8>}, {pipeline_mode = #tpu.pipeline_mode<synchronous>, transform_indices = @transform_5, window_bounds = array<i64: 8, 1>}, {pipeline_mode = #tpu.pipeline_mode<synchronous>, transform_indices = @transform_6, window_bounds = array<i64: 1, 1>}, {transform_indices = @transform_7, window_bounds = array<i64: 1, 4, 256>}]} {
    %c0 = arith.constant 0 : index
    %c0_0 = arith.constant 0 : index
    %c0_1 = arith.constant 0 : index
    %0 = vector.load %arg2[%c0, %c0_0, %c0_1] : memref<1x4x256xf32, #tpu.memory_space<vmem>>, vector<1x4x256xf32>
    %1 = vector.shape_cast %0 : vector<1x4x256xf32> to vector<4x256xf32>
    %c0_2 = arith.constant 0 : index
    %c0_3 = arith.constant 0 : index
    %c0_4 = arith.constant 0 : index
    %2 = vector.load %arg3[%c0_2, %c0_3, %c0_4] : memref<1x4x256xf32, #tpu.memory_space<vmem>>, vector<1x4x256xf32>
    %3 = vector.shape_cast %2 : vector<1x4x256xf32> to vector<4x256xf32>
    %c0_5 = arith.constant 0 : index
    %c0_6 = arith.constant 0 : index
    %4 = vector.load %arg4[%c0_5, %c0_6] : memref<4x8xf32, #tpu.memory_space<vmem>>, vector<4x8xf32>
    %c0_7 = arith.constant 0 : index
    %c0_8 = arith.constant 0 : index
    %5 = vector.load %arg5[%c0_7, %c0_8] : memref<4x8xf32, #tpu.memory_space<vmem>>, vector<4x8xf32>
    %c0_9 = arith.constant 0 : index
    %c0_10 = arith.constant 0 : index
    %6 = vector.load %arg6[%c0_9, %c0_10] : memref<1x8xf32, #tpu.memory_space<vmem>>, vector<1x8xf32>
    %c0_11 = arith.constant 0 : index
    %c0_12 = arith.constant 0 : index
    %7 = vector.load %arg7[%c0_11, %c0_12] : memref<8x1xf32, #tpu.memory_space<vmem>>, vector<8x1xf32>
    %8 = vector.extract_strided_slice %4 {offsets = [0, 0], sizes = [4, 1], strides = [1, 1]} : vector<4x8xf32> to vector<4x1xf32>
    %9 = vector.broadcast %8 : vector<4x1xf32> to vector<4x256xf32>
    %10 = arith.mulf %9, %1 : vector<4x256xf32>
    %cst = arith.constant dense<0.000000e+00> : vector<256xf32>
    %11 = vector.multi_reduction <add>, %10, %cst [0] : vector<4x256xf32> to vector<256xf32>
    %12 = vector.shape_cast %11 : vector<256xf32> to vector<1x256xf32>
    %13 = vector.extract_strided_slice %5 {offsets = [0, 0], sizes = [4, 1], strides = [1, 1]} : vector<4x8xf32> to vector<4x1xf32>
    %14 = vector.broadcast %13 : vector<4x1xf32> to vector<4x256xf32>
    %15 = arith.mulf %14, %3 : vector<4x256xf32>
    %cst_13 = arith.constant dense<0.000000e+00> : vector<256xf32>
    %16 = vector.multi_reduction <add>, %15, %cst_13 [0] : vector<4x256xf32> to vector<256xf32>
    %17 = vector.shape_cast %16 : vector<256xf32> to vector<1x256xf32>
    %18 = arith.addf %12, %17 : vector<1x256xf32>
    %19 = vector.extract_strided_slice %6 {offsets = [0, 0], sizes = [1, 1], strides = [1, 1]} : vector<1x8xf32> to vector<1x1xf32>
    %20 = vector.broadcast %19 : vector<1x1xf32> to vector<1x256xf32>
    %21 = arith.addf %18, %20 : vector<1x256xf32>
    %cst_14 = arith.constant 0.000000e+00 : f32
    %22 = vector.broadcast %cst_14 : f32 to vector<1x256xf32>
    %23 = arith.maximumf %21, %22 : vector<1x256xf32>
    %24 = vector.extract_strided_slice %7 {offsets = [0, 0], sizes = [1, 1], strides = [1, 1]} : vector<8x1xf32> to vector<1x1xf32>
    %25 = vector.broadcast %24 : vector<1x1xf32> to vector<1x256xf32>
    %26 = arith.mulf %25, %23 : vector<1x256xf32>
    %27 = vector.extract_strided_slice %4 {offsets = [0, 1], sizes = [4, 1], strides = [1, 1]} : vector<4x8xf32> to vector<4x1xf32>
    %28 = vector.broadcast %27 : vector<4x1xf32> to vector<4x256xf32>
    %29 = arith.mulf %28, %1 : vector<4x256xf32>
    %cst_15 = arith.constant dense<0.000000e+00> : vector<256xf32>
    %30 = vector.multi_reduction <add>, %29, %cst_15 [0] : vector<4x256xf32> to vector<256xf32>
    %31 = vector.shape_cast %30 : vector<256xf32> to vector<1x256xf32>
    %32 = vector.extract_strided_slice %5 {offsets = [0, 1], sizes = [4, 1], strides = [1, 1]} : vector<4x8xf32> to vector<4x1xf32>
    %33 = vector.broadcast %32 : vector<4x1xf32> to vector<4x256xf32>
    %34 = arith.mulf %33, %3 : vector<4x256xf32>
    %cst_16 = arith.constant dense<0.000000e+00> : vector<256xf32>
    %35 = vector.multi_reduction <add>, %34, %cst_16 [0] : vector<4x256xf32> to vector<256xf32>
    %36 = vector.shape_cast %35 : vector<256xf32> to vector<1x256xf32>
    %37 = arith.addf %31, %36 : vector<1x256xf32>
    %38 = vector.extract_strided_slice %6 {offsets = [0, 1], sizes = [1, 1], strides = [1, 1]} : vector<1x8xf32> to vector<1x1xf32>
    %39 = vector.broadcast %38 : vector<1x1xf32> to vector<1x256xf32>
    %40 = arith.addf %37, %39 : vector<1x256xf32>
    %cst_17 = arith.constant 0.000000e+00 : f32
    %41 = vector.broadcast %cst_17 : f32 to vector<1x256xf32>
    %42 = arith.maximumf %40, %41 : vector<1x256xf32>
    %43 = vector.extract_strided_slice %7 {offsets = [1, 0], sizes = [1, 1], strides = [1, 1]} : vector<8x1xf32> to vector<1x1xf32>
    %44 = vector.broadcast %43 : vector<1x1xf32> to vector<1x256xf32>
    %45 = arith.mulf %44, %42 : vector<1x256xf32>
    %46 = arith.addf %26, %45 : vector<1x256xf32>
    %47 = vector.extract_strided_slice %4 {offsets = [0, 2], sizes = [4, 1], strides = [1, 1]} : vector<4x8xf32> to vector<4x1xf32>
    %48 = vector.broadcast %47 : vector<4x1xf32> to vector<4x256xf32>
    %49 = arith.mulf %48, %1 : vector<4x256xf32>
    %cst_18 = arith.constant dense<0.000000e+00> : vector<256xf32>
    %50 = vector.multi_reduction <add>, %49, %cst_18 [0] : vector<4x256xf32> to vector<256xf32>
    %51 = vector.shape_cast %50 : vector<256xf32> to vector<1x256xf32>
    %52 = vector.extract_strided_slice %5 {offsets = [0, 2], sizes = [4, 1], strides = [1, 1]} : vector<4x8xf32> to vector<4x1xf32>
    %53 = vector.broadcast %52 : vector<4x1xf32> to vector<4x256xf32>
    %54 = arith.mulf %53, %3 : vector<4x256xf32>
    %cst_19 = arith.constant dense<0.000000e+00> : vector<256xf32>
    %55 = vector.multi_reduction <add>, %54, %cst_19 [0] : vector<4x256xf32> to vector<256xf32>
    %56 = vector.shape_cast %55 : vector<256xf32> to vector<1x256xf32>
    %57 = arith.addf %51, %56 : vector<1x256xf32>
    %58 = vector.extract_strided_slice %6 {offsets = [0, 2], sizes = [1, 1], strides = [1, 1]} : vector<1x8xf32> to vector<1x1xf32>
    %59 = vector.broadcast %58 : vector<1x1xf32> to vector<1x256xf32>
    %60 = arith.addf %57, %59 : vector<1x256xf32>
    %cst_20 = arith.constant 0.000000e+00 : f32
    %61 = vector.broadcast %cst_20 : f32 to vector<1x256xf32>
    %62 = arith.maximumf %60, %61 : vector<1x256xf32>
    %63 = vector.extract_strided_slice %7 {offsets = [2, 0], sizes = [1, 1], strides = [1, 1]} : vector<8x1xf32> to vector<1x1xf32>
    %64 = vector.broadcast %63 : vector<1x1xf32> to vector<1x256xf32>
    %65 = arith.mulf %64, %62 : vector<1x256xf32>
    %66 = arith.addf %46, %65 : vector<1x256xf32>
    %67 = vector.extract_strided_slice %4 {offsets = [0, 3], sizes = [4, 1], strides = [1, 1]} : vector<4x8xf32> to vector<4x1xf32>
    %68 = vector.broadcast %67 : vector<4x1xf32> to vector<4x256xf32>
    %69 = arith.mulf %68, %1 : vector<4x256xf32>
    %cst_21 = arith.constant dense<0.000000e+00> : vector<256xf32>
    %70 = vector.multi_reduction <add>, %69, %cst_21 [0] : vector<4x256xf32> to vector<256xf32>
    %71 = vector.shape_cast %70 : vector<256xf32> to vector<1x256xf32>
    %72 = vector.extract_strided_slice %5 {offsets = [0, 3], sizes = [4, 1], strides = [1, 1]} : vector<4x8xf32> to vector<4x1xf32>
    %73 = vector.broadcast %72 : vector<4x1xf32> to vector<4x256xf32>
    %74 = arith.mulf %73, %3 : vector<4x256xf32>
    %cst_22 = arith.constant dense<0.000000e+00> : vector<256xf32>
    %75 = vector.multi_reduction <add>, %74, %cst_22 [0] : vector<4x256xf32> to vector<256xf32>
    %76 = vector.shape_cast %75 : vector<256xf32> to vector<1x256xf32>
    %77 = arith.addf %71, %76 : vector<1x256xf32>
    %78 = vector.extract_strided_slice %6 {offsets = [0, 3], sizes = [1, 1], strides = [1, 1]} : vector<1x8xf32> to vector<1x1xf32>
    %79 = vector.broadcast %78 : vector<1x1xf32> to vector<1x256xf32>
    %80 = arith.addf %77, %79 : vector<1x256xf32>
    %cst_23 = arith.constant 0.000000e+00 : f32
    %81 = vector.broadcast %cst_23 : f32 to vector<1x256xf32>
    %82 = arith.maximumf %80, %81 : vector<1x256xf32>
    %83 = vector.extract_strided_slice %7 {offsets = [3, 0], sizes = [1, 1], strides = [1, 1]} : vector<8x1xf32> to vector<1x1xf32>
    %84 = vector.broadcast %83 : vector<1x1xf32> to vector<1x256xf32>
    %85 = arith.mulf %84, %82 : vector<1x256xf32>
    %86 = arith.addf %66, %85 : vector<1x256xf32>
    %87 = vector.extract_strided_slice %4 {offsets = [0, 4], sizes = [4, 1], strides = [1, 1]} : vector<4x8xf32> to vector<4x1xf32>
    %88 = vector.broadcast %87 : vector<4x1xf32> to vector<4x256xf32>
    %89 = arith.mulf %88, %1 : vector<4x256xf32>
    %cst_24 = arith.constant dense<0.000000e+00> : vector<256xf32>
    %90 = vector.multi_reduction <add>, %89, %cst_24 [0] : vector<4x256xf32> to vector<256xf32>
    %91 = vector.shape_cast %90 : vector<256xf32> to vector<1x256xf32>
    %92 = vector.extract_strided_slice %5 {offsets = [0, 4], sizes = [4, 1], strides = [1, 1]} : vector<4x8xf32> to vector<4x1xf32>
    %93 = vector.broadcast %92 : vector<4x1xf32> to vector<4x256xf32>
    %94 = arith.mulf %93, %3 : vector<4x256xf32>
    %cst_25 = arith.constant dense<0.000000e+00> : vector<256xf32>
    %95 = vector.multi_reduction <add>, %94, %cst_25 [0] : vector<4x256xf32> to vector<256xf32>
    %96 = vector.shape_cast %95 : vector<256xf32> to vector<1x256xf32>
    %97 = arith.addf %91, %96 : vector<1x256xf32>
    %98 = vector.extract_strided_slice %6 {offsets = [0, 4], sizes = [1, 1], strides = [1, 1]} : vector<1x8xf32> to vector<1x1xf32>
    %99 = vector.broadcast %98 : vector<1x1xf32> to vector<1x256xf32>
    %100 = arith.addf %97, %99 : vector<1x256xf32>
    %cst_26 = arith.constant 0.000000e+00 : f32
    %101 = vector.broadcast %cst_26 : f32 to vector<1x256xf32>
    %102 = arith.maximumf %100, %101 : vector<1x256xf32>
    %103 = vector.extract_strided_slice %7 {offsets = [4, 0], sizes = [1, 1], strides = [1, 1]} : vector<8x1xf32> to vector<1x1xf32>
    %104 = vector.broadcast %103 : vector<1x1xf32> to vector<1x256xf32>
    %105 = arith.mulf %104, %102 : vector<1x256xf32>
    %106 = arith.addf %86, %105 : vector<1x256xf32>
    %107 = vector.extract_strided_slice %4 {offsets = [0, 5], sizes = [4, 1], strides = [1, 1]} : vector<4x8xf32> to vector<4x1xf32>
    %108 = vector.broadcast %107 : vector<4x1xf32> to vector<4x256xf32>
    %109 = arith.mulf %108, %1 : vector<4x256xf32>
    %cst_27 = arith.constant dense<0.000000e+00> : vector<256xf32>
    %110 = vector.multi_reduction <add>, %109, %cst_27 [0] : vector<4x256xf32> to vector<256xf32>
    %111 = vector.shape_cast %110 : vector<256xf32> to vector<1x256xf32>
    %112 = vector.extract_strided_slice %5 {offsets = [0, 5], sizes = [4, 1], strides = [1, 1]} : vector<4x8xf32> to vector<4x1xf32>
    %113 = vector.broadcast %112 : vector<4x1xf32> to vector<4x256xf32>
    %114 = arith.mulf %113, %3 : vector<4x256xf32>
    %cst_28 = arith.constant dense<0.000000e+00> : vector<256xf32>
    %115 = vector.multi_reduction <add>, %114, %cst_28 [0] : vector<4x256xf32> to vector<256xf32>
    %116 = vector.shape_cast %115 : vector<256xf32> to vector<1x256xf32>
    %117 = arith.addf %111, %116 : vector<1x256xf32>
    %118 = vector.extract_strided_slice %6 {offsets = [0, 5], sizes = [1, 1], strides = [1, 1]} : vector<1x8xf32> to vector<1x1xf32>
    %119 = vector.broadcast %118 : vector<1x1xf32> to vector<1x256xf32>
    %120 = arith.addf %117, %119 : vector<1x256xf32>
    %cst_29 = arith.constant 0.000000e+00 : f32
    %121 = vector.broadcast %cst_29 : f32 to vector<1x256xf32>
    %122 = arith.maximumf %120, %121 : vector<1x256xf32>
    %123 = vector.extract_strided_slice %7 {offsets = [5, 0], sizes = [1, 1], strides = [1, 1]} : vector<8x1xf32> to vector<1x1xf32>
    %124 = vector.broadcast %123 : vector<1x1xf32> to vector<1x256xf32>
    %125 = arith.mulf %124, %122 : vector<1x256xf32>
    %126 = arith.addf %106, %125 : vector<1x256xf32>
    %127 = vector.extract_strided_slice %4 {offsets = [0, 6], sizes = [4, 1], strides = [1, 1]} : vector<4x8xf32> to vector<4x1xf32>
    %128 = vector.broadcast %127 : vector<4x1xf32> to vector<4x256xf32>
    %129 = arith.mulf %128, %1 : vector<4x256xf32>
    %cst_30 = arith.constant dense<0.000000e+00> : vector<256xf32>
    %130 = vector.multi_reduction <add>, %129, %cst_30 [0] : vector<4x256xf32> to vector<256xf32>
    %131 = vector.shape_cast %130 : vector<256xf32> to vector<1x256xf32>
    %132 = vector.extract_strided_slice %5 {offsets = [0, 6], sizes = [4, 1], strides = [1, 1]} : vector<4x8xf32> to vector<4x1xf32>
    %133 = vector.broadcast %132 : vector<4x1xf32> to vector<4x256xf32>
    %134 = arith.mulf %133, %3 : vector<4x256xf32>
    %cst_31 = arith.constant dense<0.000000e+00> : vector<256xf32>
    %135 = vector.multi_reduction <add>, %134, %cst_31 [0] : vector<4x256xf32> to vector<256xf32>
    %136 = vector.shape_cast %135 : vector<256xf32> to vector<1x256xf32>
    %137 = arith.addf %131, %136 : vector<1x256xf32>
    %138 = vector.extract_strided_slice %6 {offsets = [0, 6], sizes = [1, 1], strides = [1, 1]} : vector<1x8xf32> to vector<1x1xf32>
    %139 = vector.broadcast %138 : vector<1x1xf32> to vector<1x256xf32>
    %140 = arith.addf %137, %139 : vector<1x256xf32>
    %cst_32 = arith.constant 0.000000e+00 : f32
    %141 = vector.broadcast %cst_32 : f32 to vector<1x256xf32>
    %142 = arith.maximumf %140, %141 : vector<1x256xf32>
    %143 = vector.extract_strided_slice %7 {offsets = [6, 0], sizes = [1, 1], strides = [1, 1]} : vector<8x1xf32> to vector<1x1xf32>
    %144 = vector.broadcast %143 : vector<1x1xf32> to vector<1x256xf32>
    %145 = arith.mulf %144, %142 : vector<1x256xf32>
    %146 = arith.addf %126, %145 : vector<1x256xf32>
    %147 = vector.extract_strided_slice %4 {offsets = [0, 7], sizes = [4, 1], strides = [1, 1]} : vector<4x8xf32> to vector<4x1xf32>
    %148 = vector.broadcast %147 : vector<4x1xf32> to vector<4x256xf32>
    %149 = arith.mulf %148, %1 : vector<4x256xf32>
    %cst_33 = arith.constant dense<0.000000e+00> : vector<256xf32>
    %150 = vector.multi_reduction <add>, %149, %cst_33 [0] : vector<4x256xf32> to vector<256xf32>
    %151 = vector.shape_cast %150 : vector<256xf32> to vector<1x256xf32>
    %152 = vector.extract_strided_slice %5 {offsets = [0, 7], sizes = [4, 1], strides = [1, 1]} : vector<4x8xf32> to vector<4x1xf32>
    %153 = vector.broadcast %152 : vector<4x1xf32> to vector<4x256xf32>
    %154 = arith.mulf %153, %3 : vector<4x256xf32>
    %cst_34 = arith.constant dense<0.000000e+00> : vector<256xf32>
    %155 = vector.multi_reduction <add>, %154, %cst_34 [0] : vector<4x256xf32> to vector<256xf32>
    %156 = vector.shape_cast %155 : vector<256xf32> to vector<1x256xf32>
    %157 = arith.addf %151, %156 : vector<1x256xf32>
    %158 = vector.extract_strided_slice %6 {offsets = [0, 7], sizes = [1, 1], strides = [1, 1]} : vector<1x8xf32> to vector<1x1xf32>
    %159 = vector.broadcast %158 : vector<1x1xf32> to vector<1x256xf32>
    %160 = arith.addf %157, %159 : vector<1x256xf32>
    %cst_35 = arith.constant 0.000000e+00 : f32
    %161 = vector.broadcast %cst_35 : f32 to vector<1x256xf32>
    %162 = arith.maximumf %160, %161 : vector<1x256xf32>
    %163 = vector.extract_strided_slice %7 {offsets = [7, 0], sizes = [1, 1], strides = [1, 1]} : vector<8x1xf32> to vector<1x1xf32>
    %164 = vector.broadcast %163 : vector<1x1xf32> to vector<1x256xf32>
    %165 = arith.mulf %164, %162 : vector<1x256xf32>
    %166 = arith.addf %146, %165 : vector<1x256xf32>
    %c0_36 = arith.constant 0 : index
    %c0_37 = arith.constant 0 : index
    %167 = vector.load %arg8[%c0_36, %c0_37] : memref<1x1xf32, #tpu.memory_space<vmem>>, vector<1x1xf32>
    %168 = vector.broadcast %167 : vector<1x1xf32> to vector<1x256xf32>
    %169 = arith.addf %166, %168 : vector<1x256xf32>
    %170 = arith.negf %169 : vector<1x256xf32>
    %171 = math.exp %170 : vector<1x256xf32>
    %cst_38 = arith.constant 1.000000e+00 : f32
    %172 = vector.broadcast %cst_38 : f32 to vector<1x256xf32>
    %173 = arith.addf %172, %171 : vector<1x256xf32>
    %174 = arith.divf %172, %173 : vector<1x256xf32>
    %175 = vector.broadcast %174 : vector<1x256xf32> to vector<4x256xf32>
    %176 = arith.mulf %3, %175 : vector<4x256xf32>
    %c0_39 = arith.constant 0 : index
    %c0_40 = arith.constant 0 : index
    %c0_41 = arith.constant 0 : index
    %177 = vector.load %arg9[%c0_39, %c0_40, %c0_41] : memref<1x4x256xf32, #tpu.memory_space<vmem>>, vector<1x4x256xf32>
    %178 = vector.shape_cast %177 : vector<1x4x256xf32> to vector<4x256xf32>
    %179 = vector.shape_cast %176 : vector<4x256xf32> to vector<1x4x256xf32>
    tpu.vector_store %arg9[%c0_39, %c0_40, %c0_41], %179 {strides = array<i32>} : memref<1x4x256xf32, #tpu.memory_space<vmem>>, vector<1x4x256xf32>,
    return
  }
  func.func @transform_0(%arg0: i32, %arg1: i32) -> (i32, i32, i32) {
    %c0_i32 = arith.constant 0 : i32
    %c0_i32_0 = arith.constant 0 : i32
    return %arg0, %c0_i32, %arg1 : i32, i32, i32
  }
  func.func @transform_1(%arg0: i32, %arg1: i32) -> (i32, i32, i32) {
    %c0_i32 = arith.constant 0 : i32
    %c0_i32_0 = arith.constant 0 : i32
    return %arg0, %c0_i32, %arg1 : i32, i32, i32
  }
  func.func @transform_2(%arg0: i32, %arg1: i32) -> (i32, i32) {
    %c0_i32 = arith.constant 0 : i32
    %c0_i32_0 = arith.constant 0 : i32
    %c0_i32_1 = arith.constant 0 : i32
    return %c0_i32, %c0_i32_0 : i32, i32
  }
  func.func @transform_3(%arg0: i32, %arg1: i32) -> (i32, i32) {
    %c0_i32 = arith.constant 0 : i32
    %c0_i32_0 = arith.constant 0 : i32
    %c0_i32_1 = arith.constant 0 : i32
    return %c0_i32, %c0_i32_0 : i32, i32
  }
  func.func @transform_4(%arg0: i32, %arg1: i32) -> (i32, i32) {
    %c0_i32 = arith.constant 0 : i32
    %c0_i32_0 = arith.constant 0 : i32
    %c0_i32_1 = arith.constant 0 : i32
    return %c0_i32, %c0_i32_0 : i32, i32
  }
  func.func @transform_5(%arg0: i32, %arg1: i32) -> (i32, i32) {
    %c0_i32 = arith.constant 0 : i32
    %c0_i32_0 = arith.constant 0 : i32
    %c0_i32_1 = arith.constant 0 : i32
    return %c0_i32, %c0_i32_0 : i32, i32
  }
  func.func @transform_6(%arg0: i32, %arg1: i32) -> (i32, i32) {
    %c0_i32 = arith.constant 0 : i32
    %c0_i32_0 = arith.constant 0 : i32
    %c0_i32_1 = arith.constant 0 : i32
    return %c0_i32, %c0_i32_0 : i32, i32
  }
  func.func @transform_7(%arg0: i32, %arg1: i32) -> (i32, i32, i32) {
    %c0_i32 = arith.constant 0 : i32
    %c0_i32_0 = arith.constant 0 : i32
    return %arg0, %c0_i32, %arg1 : i32, i32, i32
  }
}

</mosaic_0001>

<bundles_post_ra>
// kernel: attention_3dblock.1
= control target key start
LH: loop header
LB: loop body
LE: loop exit
PB: predicated region body
PF: predicated region fallthrough
CT: control target
= control target key end

     0   :  { %s1251_s26 = smov 0   ;;  %s1253_s27 = smov 0   ;;  %s1552_s0 = inlined_call_operand.vmem [shape: f32[2,4,256], index: 0, kind: input, shape index: {}]   ;;  %s1553_s1 = inlined_call_operand.vmem [shape: f32[2,4,256], index: 1, kind: input, shape index: {}]   ;;  %s1554_s2 = inlined_call_operand.vmem [shape: f32[4,8], index: 2, kind: input, shape index: {}]   ;;  %s1555_s3 = inlined_call_operand.vmem [shape: f32[4,8], index: 3, kind: input, shape index: {}]   ;;  %s1556_s4 = inlined_call_operand.vmem [shape: f32[1,8], index: 4, kind: input, shape index: {}]   ;;  %s1557_s5 = inlined_call_operand.vmem [shape: f32[8,1], index: 5, kind: input, shape index: {}]   ;;  %s1558_s6 = inlined_call_operand.<no memory space> [shape: f32[1,1], index: 6, kind: input, shape index: {}]   ;;  %s1559_s7 = inlined_call_operand.vmem [shape: f32[2,4,256], index: 7, kind: output, shape index: {}]  }
   0x1   :  { %v12_v0 = vstv %s1558_s6  ;;  %s1255_s28 = smov 0  }
   0x2   :  { %13 = vst [vmem:[#allocation2] sm:$0x1] %v12_v0 }
   0x3 LB: > { %s31_s6 = sadd.s32 1, %s1194_s27  ;;  %p1098_p0 = scmp.ge.s32.totalorder %s1198_s28, 1  ;;  %s1198_s28 = sphi %s1255_s28, %s19_s28   ;;  %s1194_s27 = sphi %s1253_s27, %s1561_s27   ;;  %s1190_s26 = sphi %s1251_s26, %s1560_s26  }
   0x4   : > { %p33_p1 = scmp.ge.s32.totalorder %s31_s6, 2  ;;  %p277_p2 = scmp.lt.s32.totalorder %s1198_s28, 3 }
   0x6   : > { %s1563_s6 = smov (%p33_p1, %s31_s6), 0  ;;  %p278_p3 = pnand %p1098_p0, %p277_p2 }
   0x7   : > { %p327_p4 = scmp.lt.s32.totalorder (!%p278_p3), %s1190_s26, 1 }
   0x8   : > { %281 = sbr.rel (%p278_p3) target bundleno = 261 (0x105), region = 48 }
   0xd   : > { %v1272_v1 = vld [vmem:[%s1556_s4] sm:$0x1]  ;;  %v1200_v3 = vmov 0   ;;  %v1201_v4 = vmov 1   ;;  %s1565_s26 = smov (!%p327_p4, %s1190_s26), 1  ;;  %v1202_v11 = vmov 2  }
   0xe   : > { %v1277_v2 = vld [vmem:[%s1554_s2] sm:$0xf]  ;;  %1145 = vset.pattern.permute.xlu1 %v1200_v3  ;;  %1144 = vset.pattern.permute.xlu0 %v1200_v3  ;;  %s1284_s10 = sshll.u32 %s1565_s26, 3  ;;  %v1203_v14 = vmov 3   ;;  %v1204_v15 = vmov 4   ;;  %v1205_v18 = vmov 6  }
   0xf   : > { %421 = vperm.xlu1 %1145, %v1272_v1   ;;  %364 = vperm.xlu0 %1144, %v1277_v2   ;;  %v361_v5 = vld [vmem:[%s1557_s5] sm:$0xff]  ;;  %s334_s17 = scalar_lea.vmem %s1552_s0, %s1284_s10  ;;  %s344_s20 = scalar_lea.vmem %s1553_s1, %s1284_s10  ;;  %v1206_v19 = vmov 5   ;;  %v1207_v24 = vmov 7   ;;  %v933_v33 = vld [vmem:[#allocation2] sm:$0x1]  ;;  %vm375_vm0 = vcmask 1043456  }
  0x10   : > { %1146 = vset.pattern.permute.xlu2 %v1201_v4  ;;  %v359_v6 = vld [vmem:[%s1555_s3] sm:$0xf]  ;;  %s354_s23 = scalar_lea.vmem %s1559_s7, %s1284_s10 }
  0x11   : > { %437 = vperm.xlu2 %1146, %v1277_v2   ;;  %v1296_v7 = vld [vmem:[%s334_s17] sm:$0xff] }
  0x12   : > { %368 = vst [vmem:[#allocation1] ss:$2 sm:$0xff] %v1296_v7  ;;  %v1303_v8 = vld [vmem:[%s344_s20] sm:$0xff] }
  0x17   : > { %431 = vperm.xlu1 %1145, %v361_v5   ;;  %392 = vperm.xlu0 %1144, %v359_v6  }
  0x19   : > { %462 = vperm.xlu2 %1146, %v359_v6   ;;  %v1305_v9 = vld.sshfl [vmem:[#allocation1] sm:$0xff pattern:$0x75316420]  ;;  %v1307_v10 = vld.sshfl [vmem:[#allocation1 + $0x8] sm:$0xff pattern:$0x75316420] }
  0x1a   : > { %396 = vst [vmem:[#allocation1] ss:$2 sm:$0xff] %v1303_v8 }
  0x1f   : > { %1148 = vset.pattern.permute.xlu1 %v1202_v11  ;;  %1147 = vset.pattern.permute.xlu0 %v1201_v4 }
  0x20   : > { %508 = vperm.xlu1 %1148, %v1277_v2   ;;  %489 = vperm.xlu0 %1147, %v1272_v1  }
  0x21   : > { %1149 = vset.pattern.permute.xlu2 %v1202_v11  ;;  %v1312_v12 = vld.sshfl [vmem:[#allocation1] sm:$0xff pattern:$0x75316420]  ;;  %v1314_v13 = vld.sshfl [vmem:[#allocation1 + $0x8] sm:$0xff pattern:$0x75316420] }
  0x22   : > { %533 = vperm.xlu2 %1149, %v359_v6   ;;  %440 = vst [vmem:[#allocation1] ss:$2 sm:$0xff] %v1296_v7 }
  0x28   : > { %1150 = vset.pattern.permute.xlu1 %v1203_v14  ;;  %1152 = vset.pattern.permute.xlu0 %v1204_v15 }
  0x29   : > { %579 = vperm.xlu1 %1150, %v1277_v2   ;;  %650 = vperm.xlu0 %1152, %v1277_v2   ;;  %v441_v16 = vld.sshfl [vmem:[#allocation1] sm:$0xff pattern:$0x75316420]  ;;  %v442_v17 = vld.sshfl [vmem:[#allocation1 + $0x8] sm:$0xff pattern:$0x75316420] }
  0x2a   : > { %1151 = vset.pattern.permute.xlu2 %v1203_v14  ;;  %465 = vst [vmem:[#allocation1] ss:$2 sm:$0xff] %v1303_v8 }
  0x2b   : > { %604 = vperm.xlu2 %1151, %v359_v6  }
  0x31   : > { %1153 = vset.pattern.permute.xlu1 %v1204_v15  ;;  %1157 = vset.pattern.permute.xlu0 %v1205_v18  ;;  %v466_v20 = vld.sshfl [vmem:[#allocation1] sm:$0xff pattern:$0x75316420]  ;;  %v467_v21 = vld.sshfl [vmem:[#allocation1 + $0x8] sm:$0xff pattern:$0x75316420] }
  0x32   : > { %675 = vperm.xlu1 %1153, %v359_v6   ;;  %817 = vperm.xlu0 %1157, %v359_v6   ;;  %511 = vst [vmem:[#allocation1] ss:$2 sm:$0xff] %v1296_v7 }
  0x33   : > { %1154 = vset.pattern.permute.xlu2 %v1206_v19 }
  0x34   : > { %721 = vperm.xlu2 %1154, %v1277_v2  }
  0x39   : > { %v1324_v22 = vld.sshfl [vmem:[#allocation1] sm:$0xff pattern:$0x75316420]  ;;  %v1326_v23 = vld.sshfl [vmem:[#allocation1 + $0x8] sm:$0xff pattern:$0x75316420] }
  0x3a   : > { %1155 = vset.pattern.permute.xlu1 %v1206_v19  ;;  %1162 = vset.pattern.permute.xlu0 %v1204_v15  ;;  %536 = vst [vmem:[#allocation1] ss:$2 sm:$0xff] %v1303_v8 }
  0x3b   : > { %746 = vperm.xlu1 %1155, %v359_v6   ;;  %702 = vperm.xlu0 %1162, %v1272_v1  }
  0x3c   : > { %1156 = vset.pattern.permute.xlu2 %v1205_v18 }
  0x3d   : > { %792 = vperm.xlu2 %1156, %v1277_v2  }
  0x41   : > { %v1331_v25 = vld.sshfl [vmem:[#allocation1] sm:$0xff pattern:$0x75316420]  ;;  %v1333_v26 = vld.sshfl [vmem:[#allocation1 + $0x8] sm:$0xff pattern:$0x75316420] }
  0x42   : > { %582 = vst [vmem:[#allocation1] ss:$2 sm:$0xff] %v1296_v7 }
  0x43   : > { %1158 = vset.pattern.permute.xlu1 %v1207_v24  ;;  %1167 = vset.pattern.permute.xlu0 %v1200_v3 }
  0x44   : > { %863 = vperm.xlu1 %1158, %v1277_v2  }
  0x45   : > { %1159 = vset.pattern.permute.xlu2 %v1207_v24 }
  0x46   : > { %888 = vperm.xlu2 %1159, %v359_v6  }
  0x49   : > { %v1337_v27 = vld.sshfl [vmem:[#allocation1] sm:$0xff pattern:$0x75316420]  ;;  %v1339_v28 = vld.sshfl [vmem:[#allocation1 + $0x8] sm:$0xff pattern:$0x75316420] }
  0x4a   : > { %607 = vst [vmem:[#allocation1] ss:$2 sm:$0xff] %v1303_v8 }
  0x4c   : > { %1160 = vset.pattern.permute.xlu1 %v1202_v11 }
  0x4d   : > { %560 = vperm.xlu1 %1160, %v1272_v1  }
  0x4e   : > { %1161 = vset.pattern.permute.xlu2 %v1203_v14 }
  0x4f   : > { %631 = vperm.xlu2 %1161, %v1272_v1  }
  0x51   : > { %v1344_v29 = vld.sshfl [vmem:[#allocation1] sm:$0xff pattern:$0x75316420]  ;;  %v1346_v30 = vld.sshfl [vmem:[#allocation1 + $0x8] sm:$0xff pattern:$0x75316420] }
  0x52   : > { %653 = vst [vmem:[#allocation1] ss:$2 sm:$0xff] %v1296_v7 }
  0x55   : > { %1163 = vset.pattern.permute.xlu1 %v1206_v19 }
  0x56   : > { %773 = vperm.xlu1 %1163, %v1272_v1  }
  0x57   : > { %1164 = vset.pattern.permute.xlu2 %v1205_v18 }
  0x58   : > { %844 = vperm.xlu2 %1164, %v1272_v1  }
  0x59   : > { %v1350_v31 = vld.sshfl [vmem:[#allocation1] sm:$0xff pattern:$0x75316420]  ;;  %v1352_v32 = vld.sshfl [vmem:[#allocation1 + $0x8] sm:$0xff pattern:$0x75316420] }
  0x5a   : > { %678 = vst [vmem:[#allocation1] ss:$2 sm:$0xff] %v1303_v8 }
  0x5e   : > { %1165 = vset.pattern.permute.xlu1 %v1207_v24 }
  0x5f   : > { %915 = vperm.xlu1 %1165, %v1272_v1  }
  0x60   : > { %1166 = vset.pattern.permute.xlu2 %v1200_v3 }
  0x61   : > { %936 = vperm.xlu2 %1166, %v933_v33   ;;  %v1357_v34 = vld.sshfl [vmem:[#allocation1] sm:$0xff pattern:$0x75316420]  ;;  %v1359_v35 = vld.sshfl [vmem:[#allocation1 + $0x8] sm:$0xff pattern:$0x75316420] }
  0x62   : > { %724 = vst [vmem:[#allocation1] ss:$2 sm:$0xff] %v1296_v7 }
  0x69   : > { %v1362_v37 = vld.sshfl [vmem:[#allocation1] sm:$0xff pattern:$0x75316420]  ;;  %v1364_v39 = vld.sshfl [vmem:[#allocation1 + $0x8] sm:$0xff pattern:$0x75316420] }
  0x6a   : > { %749 = vst [vmem:[#allocation1] ss:$2 sm:$0xff] %v1303_v8 }
  0x6b   : > { %v438_v36 = vpop.permute.xlu2 %437 }
  0x6c   : > { %v445_v38 = vmul.f32 %v441_v16, %v438_v36  ;;  %v446_v40 = vmul.f32 %v442_v17, %v438_v36 }
  0x6e   : > { %v447_v41 = vsel %vm375_vm0, %v445_v38, 0.0  ;;  %v454_v43 = vsel %vm375_vm0, %v446_v40, 0.0 }
  0x6f   : > { %v448_v46 = vrot.slane %v447_v41, 4  ;;  %v455_v49 = vrot.slane %v454_v43, 4 }
  0x71   : > { %v1371_v51 = vld.sshfl [vmem:[#allocation1] sm:$0xff pattern:$0x75316420]  ;;  %v1373_v52 = vld.sshfl [vmem:[#allocation1 + $0x8] sm:$0xff pattern:$0x75316420]  ;;  %v449_v54 = vadd.f32 %v448_v46, %v447_v41  ;;  %v456_v55 = vadd.f32 %v455_v49, %v454_v43 }
  0x72   : > { %795 = vst [vmem:[#allocation1] ss:$2 sm:$0xff] %v1296_v7 }
  0x73   : > { %v463_v42 = vpop.permute.xlu2 %462  ;;  %v450_v59 = vrot.slane %v449_v54, 2  ;;  %v457_v60 = vrot.slane %v456_v55, 2 }
  0x74   : > { %v470_v44 = vmul.f32 %v466_v20, %v463_v42  ;;  %v471_v45 = vmul.f32 %v467_v21, %v463_v42 }
  0x75   : > { %v451_v3 = vadd.f32 %v450_v59, %v449_v54  ;;  %v458_v6 = vadd.f32 %v457_v60, %v456_v55 }
  0x76   : > { %v472_v47 = vsel %vm375_vm0, %v470_v44, 0.0  ;;  %v479_v48 = vsel %vm375_vm0, %v471_v45, 0.0 }
  0x77   : > { %v473_v50 = vrot.slane %v472_v47, 4  ;;  %v480_v53 = vrot.slane %v479_v48, 4  ;;  %v452_v24 = vrot.slane %v451_v3, 1  ;;  %v459_v38 = vrot.slane %v458_v6, 1 }
  0x79   : > { %v474_v56 = vadd.f32 %v473_v50, %v472_v47  ;;  %v481_v58 = vadd.f32 %v480_v53, %v479_v48  ;;  %v1376_v62 = vld.sshfl [vmem:[#allocation1] sm:$0xff pattern:$0x75316420]  ;;  %v1380_v2 = vld.sshfl [vmem:[#allocation1 + $0x8] sm:$0xff pattern:$0x75316420] }
  0x7a   : > { %820 = vst [vmem:[#allocation1] ss:$2 sm:$0xff] %v1303_v8 }
  0x7b   : > { %v475_v61 = vrot.slane %v474_v56, 2  ;;  %v482_v63 = vrot.slane %v481_v58, 2 }
  0x7c   : > { %v534_v57 = vpop.permute.xlu2 %533 }
  0x7d   : > { %v476_v11 = vadd.f32 %v475_v61, %v474_v56  ;;  %v541_v16 = vmul.f32 %v1331_v25, %v534_v57  ;;  %v542_v17 = vmul.f32 %v1333_v26, %v534_v57  ;;  %v483_v18 = vadd.f32 %v482_v63, %v481_v58 }
  0x7e   : > { %v460_v56 = vadd.f32 %v459_v38, %v458_v6 }
  0x7f   : > { %v543_v40 = vsel %vm375_vm0, %v541_v16, 0.0  ;;  %v550_v41 = vsel %vm375_vm0, %v542_v17, 0.0  ;;  %v477_v42 = vrot.slane %v476_v11, 1 }
  0x80   : > { %v544_v53 = vrot.slane %v543_v40, 4  ;;  %v551_v54 = vrot.slane %v550_v41, 4 }
  0x81   : > { %v1378_v0 = vpop.permute.xlu1 %421  ;;  %v365_v1 = vpop.permute.xlu0 %364  ;;  %v1398_v49 = vld.sshfl [vmem:[#allocation1] sm:$0xff pattern:$0x75316420]  ;;  %v1400_v50 = vld.sshfl [vmem:[#allocation1 + $0x8] sm:$0xff pattern:$0x75316420] }
  0x82   : > { %v373_v4 = vmul.f32 %v1305_v9, %v365_v1  ;;  %v374_v5 = vmul.f32 %v1307_v10, %v365_v1  ;;  %866 = vst [vmem:[#allocation1] ss:$2 sm:$0xff] %v1296_v7 }
  0x84   : > { %v376_v14 = vsel %vm375_vm0, %v373_v4, 0.0  ;;  %v383_v15 = vsel %vm375_vm0, %v374_v5, 0.0  ;;  %v545_v5 = vadd.f32 %v544_v53, %v543_v40 }
  0x85   : > { %v377_v19 = vrot.slane %v376_v14, 4  ;;  %v384_v20 = vrot.slane %v383_v15, 4  ;;  %v605_v21 = vpop.permute.xlu2 %604 }
  0x86   : > { %v612_v9 = vmul.f32 %v1344_v29, %v605_v21  ;;  %v613_v36 = vmul.f32 %v1346_v30, %v605_v21  ;;  %v484_v29 = vrot.slane %v483_v18, 1  ;;  %v453_v30 = vadd.f32 %v452_v24, %v451_v3 }
  0x87   : > { %v378_v10 = vadd.f32 %v377_v19, %v376_v14  ;;  %v385_v33 = vadd.f32 %v384_v20, %v383_v15  ;;  %v552_v14 = vadd.f32 %v551_v54, %v550_v41  ;;  %v546_v53 = vrot.slane %v545_v5, 2 }
  0x88   : > { %v614_v25 = vsel %vm375_vm0, %v612_v9, 0.0  ;;  %v621_v55 = vsel %vm375_vm0, %v613_v36, 0.0  ;;  %v485_v63 = vadd.f32 %v484_v29, %v483_v18 }
  0x89   : > { %v379_v26 = vrot.slane %v378_v10, 2  ;;  %v386_v43 = vrot.slane %v385_v33, 2  ;;  %v1394_v44 = vpop.permute.xlu1 %431  ;;  %v393_v45 = vpop.permute.xlu0 %392  ;;  %v615_v46 = vrot.slane %v614_v25, 4  ;;  %v622_v3 = vrot.slane %v621_v55, 4 }
  0x8a   : > { %v401_v47 = vmul.f32 %v1312_v12, %v393_v45  ;;  %v402_v48 = vmul.f32 %v1314_v13, %v393_v45  ;;  %v478_v12 = vadd.f32 %v477_v42, %v476_v11  ;;  %v487_v9 = vadd.f32 %v485_v63, %v460_v56  ;;  %v1410_v40 = vld.sshfl [vmem:[#allocation1] sm:$0xff pattern:$0x75316420]  ;;  %v1414_v42 = vld.sshfl [vmem:[#allocation1 + $0x8] sm:$0xff pattern:$0x75316420] }
  0x8b   : > { %v616_v59 = vadd.f32 %v615_v46, %v614_v25  ;;  %v380_v60 = vadd.f32 %v379_v26, %v378_v10  ;;  %v387_v1 = vadd.f32 %v386_v43, %v385_v33  ;;  %v623_v10 = vadd.f32 %v622_v3, %v621_v55  ;;  %891 = vst [vmem:[#allocation1] ss:$2 sm:$0xff] %v1303_v8 }
  0x8c   : > { %v403_v57 = vsel %vm375_vm0, %v401_v47, 0.0  ;;  %v410_v58 = vsel %vm375_vm0, %v402_v48, 0.0  ;;  %v486_v19 = vadd.f32 %v478_v12, %v453_v30  ;;  %v553_v54 = vrot.slane %v552_v14, 2 }
  0x8d   : > { %v404_v13 = vrot.slane %v403_v57, 4  ;;  %v411_v61 = vrot.slane %v410_v58, 4  ;;  %v617_v6 = vrot.slane %v616_v59, 2  ;;  %v381_v20 = vrot.slane %v380_v60, 1 }
  0x8e   : > { %v722_v4 = vpop.permute.xlu2 %721  ;;  %v388_v24 = vrot.slane %v387_v1, 1 }
  0x8f   : > { %v405_v15 = vadd.f32 %v404_v13, %v403_v57  ;;  %v412_v16 = vadd.f32 %v411_v61, %v410_v58  ;;  %v729_v7 = vmul.f32 %v1362_v37, %v722_v4  ;;  %v730_v17 = vmul.f32 %v1364_v39, %v722_v4 }
  0x90   : > { %v618_v26 = vadd.f32 %v617_v6, %v616_v59  ;;  %v382_v56 = vadd.f32 %v381_v20, %v380_v60  ;;  %v624_v57 = vrot.slane %v623_v10, 2  ;;  %v389_v59 = vadd.f32 %v388_v24, %v387_v1 }
  0x91   : > { %v406_v21 = vrot.slane %v405_v15, 2  ;;  %v413_v11 = vrot.slane %v412_v16, 2  ;;  %v731_v33 = vsel %vm375_vm0, %v729_v7, 0.0  ;;  %v738_v36 = vsel %vm375_vm0, %v730_v17, 0.0 }
  0x92   : > { %v509_v18 = vpop.permute.xlu1 %508  ;;  %v490_v38 = vpop.permute.xlu0 %489  ;;  %v732_v43 = vrot.slane %v731_v33, 4  ;;  %v739_v45 = vrot.slane %v738_v36, 4  ;;  %v619_v61 = vrot.slane %v618_v26, 1  ;;  %v1420_v6 = vadd.f32 %v546_v53, %v545_v5 }
  0x93   : > { %v407_v41 = vadd.f32 %v406_v21, %v405_v15  ;;  %v414_v25 = vadd.f32 %v413_v11, %v412_v16  ;;  %v516_v37 = vmul.f32 %v1324_v22, %v509_v18  ;;  %v517_v39 = vmul.f32 %v1326_v23, %v509_v18 }
  0x94   : > { %v492_v46 = vperm.slane %v490_v38, 0  ;;  %v733_v58 = vadd.f32 %v732_v43, %v731_v33  ;;  %v740_v12 = vadd.f32 %v739_v45, %v738_v36  ;;  %v424_v16 = vperm.slane %v1378_v0, 0 }
  0x95   : > { %v408_v29 = vrot.slane %v407_v41, 1  ;;  %v415_v47 = vrot.slane %v414_v25, 1  ;;  %v518_v48 = vsel %vm375_vm0, %v516_v37, 0.0  ;;  %v525_v30 = vsel %vm375_vm0, %v517_v39, 0.0 }
  0x96   : > { %v519_v55 = vrot.slane %v518_v48, 4  ;;  %v526_v22 = vrot.slane %v525_v30, 4  ;;  %v493_v4 = vadd.f32 %v492_v46, %v486_v19  ;;  %v494_v15 = vadd.f32 %v492_v46, %v487_v9 }
  0x97   : > { %v409_v23 = vadd.f32 %v408_v29, %v407_v41  ;;  %v793_v13 = vpop.permute.xlu2 %792  ;;  %v416_v63 = vadd.f32 %v415_v47, %v414_v25  ;;  %v1422_v17 = vadd.f32 %v553_v54, %v552_v14  ;;  %v1424_v60 = vadd.f32 %v624_v57, %v623_v10  ;;  %v892_v47 = vld.sshfl [vmem:[#allocation1] sm:$0xff pattern:$0x75316420] }
  0x98   : > { %v520_v3 = vadd.f32 %v519_v55, %v518_v48  ;;  %v527_v7 = vadd.f32 %v526_v22, %v525_v30  ;;  %v734_v20 = vrot.slane %v733_v58, 2  ;;  %v741_v1 = vrot.slane %v740_v12, 2  ;;  %v893_v48 = vld.sshfl [vmem:[#allocation1 + $0x8] sm:$0xff pattern:$0x75316420] }
  0x99   : > { %v417_v21 = vadd.f32 %v409_v23, %v382_v56  ;;  %v800_v24 = vmul.f32 %v1376_v62, %v793_v13  ;;  %v801_v18 = vmul.f32 %v1380_v2, %v793_v13  ;;  %v1428_v33 = vadd.f32 %v619_v61, %v618_v26 }
  0x9a   : > { %v418_v19 = vadd.f32 %v416_v63, %v389_v59  ;;  %v521_v9 = vrot.slane %v520_v3, 2  ;;  %v495_v0 = vmax.f32 %v493_v4, 0.0  ;;  %v496_v5 = vmax.f32 %v494_v15, 0.0 }
  0x9b   : > { %v580_v11 = vpop.permute.xlu1 %579  ;;  %v651_v36 = vpop.permute.xlu0 %650  ;;  %v528_v38 = vrot.slane %v527_v7, 2  ;;  %v802_v14 = vsel %vm375_vm0, %v800_v24, 0.0  ;;  %v1433_v25 = vadd.f32 %v734_v20, %v733_v58  ;;  %v425_v37 = vadd.f32 %v424_v16, %v417_v21 }
  0x9c   : > { %v587_v10 = vmul.f32 %v1337_v27, %v580_v11  ;;  %v588_v41 = vmul.f32 %v1339_v28, %v580_v11  ;;  %v803_v62 = vrot.slane %v802_v14, 4  ;;  %v809_v2 = vsel %vm375_vm0, %v801_v18, 0.0 }
  0x9d   : > { %v658_v43 = vmul.f32 %v1350_v31, %v651_v36  ;;  %v659_v45 = vmul.f32 %v1352_v32, %v651_v36  ;;  %v1440_v46 = vadd.f32 %v741_v1, %v740_v12  ;;  %v1442_v29 = vadd.f32 %v424_v16, %v418_v19 }
  0x9e   : > { %v589_v39 = vsel %vm375_vm0, %v587_v10, 0.0  ;;  %v596_v26 = vsel %vm375_vm0, %v588_v41, 0.0  ;;  %v1445_v27 = vmul.f32 %v495_v0, %v1394_v44  ;;  %v1448_v28 = vmul.f32 %v496_v5, %v1394_v44 }
  0x9f   : > { %v590_v30 = vrot.slane %v589_v39, 4  ;;  %v597_v53 = vrot.slane %v596_v26, 4  ;;  %v660_v54 = vsel %vm375_vm0, %v658_v43, 0.0  ;;  %v667_v31 = vsel %vm375_vm0, %v659_v45, 0.0 }
  0xa0   : > { %v889_v55 = vpop.permute.xlu2 %888  ;;  %v1452_v32 = vadd.f32 %v521_v9, %v520_v3  ;;  %v427_v22 = vmax.f32 %v425_v37, 0.0  ;;  %v804_v56 = vadd.f32 %v803_v62, %v802_v14  ;;  %v810_v23 = vrot.slane %v809_v2, 4 }
  0xa1   : > { %v1454_v57 = vadd.f32 %v528_v38, %v527_v7  ;;  %v591_v58 = vadd.f32 %v590_v30, %v589_v39  ;;  %v598_v59 = vadd.f32 %v597_v53, %v596_v26  ;;  %v896_v12 = vmul.f32 %v892_v47, %v889_v55 }
  0xa2   : > { %v428_v61 = vmax.f32 %v1442_v29, 0.0  ;;  %v661_v63 = vrot.slane %v660_v54, 4  ;;  %v668_v4 = vrot.slane %v667_v31, 4  ;;  %v897_v15 = vmul.f32 %v893_v48, %v889_v55 }
  0xa3   : > { %v501_v16 = vrot.slane %v1445_v27, 1  ;;  %v592_v21 = vrot.slane %v591_v58, 2  ;;  %v599_v20 = vrot.slane %v598_v59, 2  ;;  %v898_v3 = vsel %vm375_vm0, %v896_v12, 0.0 }
  0xa4   : > { %v676_v13 = vpop.permute.xlu1 %675  ;;  %v1460_v11 = vmul.f32 %v1394_v44, %v427_v22  ;;  %v502_v7 = vrot.slane %v1448_v28, 1  ;;  %v805_v1 = vrot.slane %v804_v56, 2  ;;  %v811_v24 = vadd.f32 %v810_v23, %v809_v2  ;;  %v818_v18 = vpop.permute.xlu0 %817 }
  0xa5   : > { %v593_v19 = vadd.f32 %v592_v21, %v591_v58  ;;  %v600_v9 = vadd.f32 %v599_v20, %v598_v59  ;;  %v683_v0 = vmul.f32 %v1357_v34, %v676_v13  ;;  %v684_v5 = vmul.f32 %v1359_v35, %v676_v13 }
  0xa6   : > { %v662_v36 = vadd.f32 %v661_v63, %v660_v54  ;;  %v669_v38 = vadd.f32 %v668_v4, %v667_v31  ;;  %v899_v14 = vrot.slane %v898_v3, 4  ;;  %v905_v10 = vsel %vm375_vm0, %v897_v15, 0.0 }
  0xa7   : > { %v685_v41 = vsel %vm375_vm0, %v683_v0, 0.0  ;;  %v692_v37 = vsel %vm375_vm0, %v684_v5, 0.0  ;;  %v825_v62 = vmul.f32 %v1398_v49, %v818_v18  ;;  %v826_v2 = vmul.f32 %v1400_v50, %v818_v18 }
  0xa8   : > { %v806_v39 = vadd.f32 %v805_v1, %v804_v56  ;;  %v812_v26 = vrot.slane %v811_v24, 2  ;;  %v686_v43 = vrot.slane %v685_v41, 4  ;;  %v693_v45 = vrot.slane %v692_v37, 4 }
  0xa9   : > { %v827_v34 = vsel %vm375_vm0, %v825_v62, 0.0  ;;  %v834_v35 = vsel %vm375_vm0, %v826_v2, 0.0  ;;  %v632_v47 = vpop.permute.xlu2 %631  ;;  %v594_v48 = vrot.slane %v593_v19, 1  ;;  %v601_v30 = vrot.slane %v600_v9, 1 }
  0xaa   : > { %v663_v53 = vrot.slane %v662_v36, 2  ;;  %v670_v54 = vrot.slane %v669_v38, 2  ;;  %v906_v31 = vrot.slane %v905_v10, 4  ;;  %v687_v55 = vadd.f32 %v686_v43, %v685_v41 }
  0xab   : > { %v900_v23 = vadd.f32 %v899_v14, %v898_v3  ;;  %v828_v49 = vrot.slane %v827_v34, 4  ;;  %v835_v58 = vrot.slane %v834_v35, 4  ;;  %v595_v50 = vadd.f32 %v594_v48, %v593_v19 }
  0xac   : > { %v694_v56 = vadd.f32 %v693_v45, %v692_v37  ;;  %v602_v59 = vadd.f32 %v601_v30, %v600_v9  ;;  %v626_v12 = vrot.slane %v1424_v60, 1  ;;  %v634_v13 = vperm.slane %v632_v47, 0 }
  0xad   : > { %v747_v22 = vpop.permute.xlu1 %746  ;;  %v829_v63 = vadd.f32 %v828_v49, %v827_v34  ;;  %v836_v4 = vadd.f32 %v835_v58, %v834_v35  ;;  %v628_v15 = vadd.f32 %v1428_v33, %v595_v50  ;;  %v907_v20 = vadd.f32 %v906_v31, %v905_v10 }
  0xae   : > { %v754_v21 = vmul.f32 %v1371_v51, %v747_v22  ;;  %v688_v1 = vrot.slane %v687_v55, 2  ;;  %v627_v18 = vadd.f32 %v626_v12, %v1424_v60  ;;  %v755_v3 = vmul.f32 %v1373_v52, %v747_v22 }
  0xaf   : > { %v830_v0 = vrot.slane %v829_v63, 2  ;;  %v837_v5 = vrot.slane %v836_v4, 2  ;;  %v635_v19 = vadd.f32 %v634_v13, %v628_v15  ;;  %v695_v14 = vrot.slane %v694_v56, 2 }
  0xb0   : > { %v756_v9 = vsel %vm375_vm0, %v754_v21, 0.0  ;;  %v629_v41 = vadd.f32 %v627_v18, %v602_v59  ;;  %v763_v62 = vsel %vm375_vm0, %v755_v3, 0.0  ;;  %v435_v51 = vmul.f32 %v1394_v44, %v428_v61 }
  0xb1   : > { %v757_v37 = vrot.slane %v756_v9, 4  ;;  %v813_v33 = vadd.f32 %v812_v26, %v811_v24  ;;  %v901_v10 = vrot.slane %v900_v23, 2  ;;  %v831_v2 = vadd.f32 %v830_v0, %v829_v63 }
  0xb2   : > { %v664_v60 = vadd.f32 %v663_v53, %v662_v36  ;;  %v908_v43 = vrot.slane %v907_v20, 2  ;;  %v838_v52 = vadd.f32 %v837_v5, %v836_v4  ;;  %v807_v45 = vrot.slane %v806_v39, 1 }
  0xb3   : > { %v671_v34 = vadd.f32 %v670_v54, %v669_v38  ;;  %v689_v35 = vadd.f32 %v688_v1, %v687_v55  ;;  %v637_v47 = vmax.f32 %v635_v19, 0.0  ;;  %v764_v48 = vrot.slane %v763_v62, 4  ;;  %v845_v54 = vpop.permute.xlu2 %844 }
  0xb4   : > { %v1485_v31 = vadd.f32 %v501_v16, %v1460_v11  ;;  %v696_v29 = vadd.f32 %v695_v14, %v694_v56  ;;  %v636_v22 = vadd.f32 %v634_v13, %v629_v41  ;;  %v758_v61 = vadd.f32 %v757_v37, %v756_v9 }
  0xb5   : > { %v1489_v24 = vadd.f32 %v502_v7, %v435_v51  ;;  %v1491_v36 = vadd.f32 %v901_v10, %v900_v23  ;;  %v814_v26 = vrot.slane %v813_v33, 1  ;;  %v832_v38 = vrot.slane %v831_v2, 1  ;;  %v703_v7 = vpop.permute.xlu0 %702 }
  0xb6   : > { %v864_v30 = vpop.permute.xlu1 %863  ;;  %v1493_v53 = vadd.f32 %v908_v43, %v907_v20  ;;  %v808_v55 = vadd.f32 %v807_v45, %v806_v39  ;;  %v839_v49 = vrot.slane %v838_v52, 1  ;;  %v665_v58 = vrot.slane %v664_v60, 1 }
  0xb7   : > { %v1496_v27 = vmul.f32 %v637_v47, %v1394_v44  ;;  %v765_v16 = vadd.f32 %v764_v48, %v763_v62  ;;  %v672_v11 = vrot.slane %v671_v34, 1  ;;  %v690_v50 = vrot.slane %v689_v35, 1 }
  0xb8   : > { %v638_v56 = vmax.f32 %v636_v22, 0.0  ;;  %v759_v28 = vrot.slane %v758_v61, 2  ;;  %v666_v59 = vadd.f32 %v665_v58, %v664_v60  ;;  %v697_v23 = vrot.slane %v696_v29, 1 }
  0xb9   : > { %v815_v12 = vadd.f32 %v814_v26, %v813_v33  ;;  %v833_v13 = vadd.f32 %v832_v38, %v831_v2  ;;  %v847_v63 = vperm.slane %v845_v54, 0  ;;  %v691_v4 = vadd.f32 %v690_v50, %v689_v35 }
  0xba   : > { %v840_v15 = vadd.f32 %v839_v49, %v838_v52  ;;  %v871_v39 = vmul.f32 %v1410_v40, %v864_v30  ;;  %v872_v21 = vmul.f32 %v1414_v42, %v864_v30  ;;  %v523_v20 = vrot.slane %v1452_v32, 1 }
  0xbb   : > { %v673_v1 = vadd.f32 %v672_v11, %v671_v34  ;;  %v698_v18 = vadd.f32 %v697_v23, %v696_v29  ;;  %v699_v3 = vadd.f32 %v691_v4, %v666_v59  ;;  %v705_v0 = vperm.slane %v703_v7, 0 }
  0xbc   : > { %v643_v5 = vrot.slane %v1496_v27, 3  ;;  %v873_v19 = vsel %vm375_vm0, %v871_v39, 0.0  ;;  %v880_v9 = vsel %vm375_vm0, %v872_v21, 0.0  ;;  %v530_v41 = vrot.slane %v1454_v57, 1 }
  0xbd   : > { %v1506_v37 = vmul.f32 %v638_v56, %v1394_v44  ;;  %v760_v40 = vadd.f32 %v759_v28, %v758_v61  ;;  %v766_v42 = vrot.slane %v765_v16, 2  ;;  %v874_v62 = vrot.slane %v873_v19, 4 }
  0xbe   : > { %v841_v51 = vadd.f32 %v833_v13, %v808_v55  ;;  %v881_v33 = vrot.slane %v880_v9, 4  ;;  %v524_v10 = vadd.f32 %v523_v20, %v1452_v32  ;;  %v548_v2 = vrot.slane %v1420_v6, 1 }
  0xbf   : > { %v561_v14 = vpop.permute.xlu1 %560  ;;  %v842_v60 = vadd.f32 %v840_v15, %v815_v12  ;;  %v700_v43 = vadd.f32 %v698_v18, %v673_v1  ;;  %v706_v52 = vadd.f32 %v705_v0, %v699_v3  ;;  %v875_v45 = vadd.f32 %v874_v62, %v873_v19 }
  0xc0   : > { %v882_v34 = vadd.f32 %v881_v33, %v880_v9  ;;  %v531_v35 = vadd.f32 %v530_v41, %v1454_v57  ;;  %v549_v47 = vadd.f32 %v548_v2, %v1420_v6  ;;  %v555_v48 = vrot.slane %v1422_v17, 1 }
  0xc1   : > { %v767_v30 = vadd.f32 %v766_v42, %v765_v16  ;;  %v876_v29 = vrot.slane %v875_v45, 2  ;;  %v563_v22 = vperm.slane %v561_v14, 0  ;;  %v736_v61 = vrot.slane %v1433_v25, 1 }
  0xc2   : > { %v848_v26 = vadd.f32 %v847_v63, %v841_v51  ;;  %v883_v32 = vrot.slane %v882_v34, 2  ;;  %v556_v38 = vadd.f32 %v555_v48, %v1422_v17  ;;  %v557_v54 = vadd.f32 %v549_v47, %v524_v10 }
  0xc3   : > { %v849_v55 = vadd.f32 %v847_v63, %v842_v60  ;;  %v707_v49 = vadd.f32 %v705_v0, %v700_v43  ;;  %v877_v58 = vadd.f32 %v876_v29, %v875_v45  ;;  %v743_v11 = vrot.slane %v1440_v46, 1 }
  0xc4   : > { %v708_v57 = vmax.f32 %v706_v52, 0.0  ;;  %v884_v50 = vadd.f32 %v883_v32, %v882_v34  ;;  %v558_v6 = vadd.f32 %v556_v38, %v531_v35  ;;  %v564_v56 = vadd.f32 %v563_v22, %v557_v54 }
  0xc5   : > { %v737_v16 = vadd.f32 %v736_v61, %v1433_v25  ;;  %v744_v7 = vadd.f32 %v743_v11, %v1440_v46  ;;  %v761_v59 = vrot.slane %v760_v40, 1  ;;  %v768_v23 = vrot.slane %v767_v30, 1 }
  0xc6   : > { %v565_v12 = vadd.f32 %v563_v22, %v558_v6  ;;  %v566_v13 = vmax.f32 %v564_v56, 0.0  ;;  %v878_v4 = vrot.slane %v877_v58, 1  ;;  %v885_v39 = vrot.slane %v884_v50, 1  ;;  %v937_v56 = vpop.permute.xlu2 %936 }
  0xc7   : > { %v762_v63 = vadd.f32 %v761_v59, %v760_v40  ;;  %v769_v15 = vadd.f32 %v768_v23, %v767_v30  ;;  %v903_v21 = vrot.slane %v1491_v36, 1  ;;  %v709_v20 = vmax.f32 %v707_v49, 0.0 }
  0xc8   : > { %v774_v28 = vpop.permute.xlu1 %773  ;;  %v567_v1 = vmax.f32 %v565_v12, 0.0  ;;  %v568_v18 = vmul.f32 %v566_v13, %v1394_v44  ;;  %v910_v3 = vrot.slane %v1493_v53, 1  ;;  %v850_v25 = vmax.f32 %v848_v26, 0.0 }
  0xc9   : > { %v776_v17 = vperm.slane %v774_v28, 0  ;;  %v710_v46 = vmul.f32 %v708_v57, %v1394_v44  ;;  %v770_v0 = vadd.f32 %v762_v63, %v737_v16  ;;  %v771_v19 = vadd.f32 %v769_v15, %v744_v7 }
  0xca   : > { %v569_v9 = vmul.f32 %v567_v1, %v1394_v44  ;;  %v572_v14 = vrot.slane %v568_v18, 2  ;;  %v879_v41 = vadd.f32 %v878_v4, %v877_v58  ;;  %v904_v40 = vadd.f32 %v903_v21, %v1491_v36 }
  0xcb   : > { %v777_v42 = vadd.f32 %v776_v17, %v770_v0  ;;  %v778_v62 = vadd.f32 %v776_v17, %v771_v19  ;;  %v886_v51 = vadd.f32 %v885_v39, %v884_v50  ;;  %v911_v33 = vadd.f32 %v910_v3, %v1493_v53 }
  0xcc   : > { %v851_v10 = vmax.f32 %v849_v55, 0.0  ;;  %v711_v2 = vmul.f32 %v709_v20, %v1394_v44  ;;  %v573_v60 = vrot.slane %v569_v9, 2  ;;  %v576_v43 = vadd.f32 %v572_v14, %v1485_v31 }
  0xcd   : > { %v644_v52 = vrot.slane %v1506_v37, 3  ;;  %v852_v45 = vmul.f32 %v850_v25, %v1394_v44  ;;  %v779_v34 = vmax.f32 %v777_v42, 0.0  ;;  %v780_v35 = vmax.f32 %v778_v62, 0.0 }
  0xce   : > { %v714_v47 = vrot.slane %v710_v46, 4  ;;  %v577_v36 = vadd.f32 %v573_v60, %v1489_v24  ;;  %v647_v48 = vadd.f32 %v643_v5, %v576_v43  ;;  %v912_v53 = vadd.f32 %v904_v40, %v879_v41 }
  0xcf   : > { %v781_v29 = vmul.f32 %v779_v34, %v1394_v44  ;;  %v782_v22 = vmul.f32 %v780_v35, %v1394_v44  ;;  %v913_v61 = vadd.f32 %v911_v33, %v886_v51  ;;  %v853_v37 = vmul.f32 %v851_v10, %v1394_v44 }
  0xd0   : > { %v715_v26 = vrot.slane %v711_v2, 4  ;;  %v648_v32 = vadd.f32 %v644_v52, %v577_v36  ;;  %v718_v38 = vadd.f32 %v714_v47, %v647_v48  ;;  %v856_v27 = vrot.slane %v852_v45, 6 }
  0xd1   : > { %v916_v30 = vpop.permute.xlu1 %915  ;;  %v785_v54 = vrot.slane %v781_v29, 5  ;;  %v786_v55 = vrot.slane %v782_v22, 5  ;;  %v857_v50 = vrot.slane %v853_v37, 6  ;;  %v939_v13 = vperm.slane %v937_v56, 0 }
  0xd2   : > { %v918_v31 = vperm.slane %v916_v30, 0  ;;  %v719_v58 = vadd.f32 %v715_v26, %v648_v32 }
  0xd3   : > { %v789_v5 = vadd.f32 %v785_v54, %v718_v38 }
  0xd4   : > { %v919_v49 = vadd.f32 %v918_v31, %v912_v53  ;;  %v920_v24 = vadd.f32 %v918_v31, %v913_v61  ;;  %v790_v6 = vadd.f32 %v786_v55, %v719_v58 }
  0xd5   : > { %v860_v7 = vadd.f32 %v856_v27, %v789_v5 }
  0xd6   : > { %v921_v11 = vmax.f32 %v919_v49, 0.0  ;;  %v922_v57 = vmax.f32 %v920_v24, 0.0  ;;  %v861_v59 = vadd.f32 %v857_v50, %v790_v6 }
  0xd8   : > { %v923_v28 = vmul.f32 %v921_v11, %v1394_v44  ;;  %v924_v16 = vmul.f32 %v922_v57, %v1394_v44 }
  0xda   : > { %v927_v23 = vrot.slane %v923_v28, 7  ;;  %v928_v12 = vrot.slane %v924_v16, 7 }
  0xdc   : > { %v931_v17 = vadd.f32 %v927_v23, %v860_v7  ;;  %v932_v4 = vadd.f32 %v928_v12, %v861_v59 }
  0xde   : > { %v940_v63 = vadd.f32 %v939_v13, %v931_v17  ;;  %v941_v15 = vadd.f32 %v939_v13, %v932_v4 }
  0xe0   : > { %v1105_v39 = vmul.f32 -1.442695, %v940_v63  ;;  %v1106_v21 = vmul.f32 -1.442695, %v941_v15 }
  0xe2   : > { %1168 = vpow2.f32 %v1105_v39 }
  0xe3   : > { %1170 = vpow2.f32 %v1106_v21 }
  0xe8   : > { %v1169_v20 = vpop.eup %1168 }
  0xe9   : > { %v1171_v1 = vpop.eup %1170  ;;  %v948_v18 = vadd.f32 1.0, %v1169_v20 }
  0xea   : > { %v949_v3 = vadd.f32 1.0, %v1171_v1 }
  0xeb   : > { %1172 = vrcp.f32 %v948_v18  ;;  %v961_v41 = vand.u32 2147483648, %v948_v18  ;;  %v959_v42 = vand.u32 2147483647, %v948_v18  ;;  %vm955_vm3 = vweird.f32 %v948_v18 }
  0xec   : > { %1174 = vrcp.f32 %v949_v3  ;;  %v976_v40 = vand.u32 2147483648, %v949_v3  ;;  %v974_v51 = vand.u32 2147483647, %v949_v3  ;;  %vm970_vm5 = vweird.f32 %v949_v3 }
  0xed   : > { %v962_v60 = vor.u32 1.1754944e-38, %v961_v41  ;;  %vm960_vm7 = vcmp.eq.f32.partialorder %v959_v42, 8.507059e+37 }
  0xee   : > { %v977_v43 = vor.u32 1.1754944e-38, %v976_v40  ;;  %vm975_vm8 = vcmp.eq.f32.partialorder %v974_v51, 8.507059e+37 }
  0xf1   : > { %v1173_v44 = vpop.eup %1172 }
  0xf2   : > { %v1175_v25 = vpop.eup %1174  ;;  %v951_v46 = vmul.f32 %v1173_v44, %v948_v18  ;;  %vm956_vm1 = vweird.f32 %v1173_v44 }
  0xf3   : > { %v966_v0 = vmul.f32 %v1175_v25, %v949_v3  ;;  %vm971_vm2 = vweird.f32 %v1175_v25  ;;  %vm957_vm4 = vmor %vm955_vm3, %vm956_vm1 }
  0xf4   : > { %v952_v19 = vsub.f32 1.0, %v951_v46  ;;  %vm972_vm6 = vmor %vm970_vm5, %vm971_vm2 }
  0xf5   : > { %v967_v9 = vsub.f32 1.0, %v966_v0 }
  0xf6   : > { %v953_v14 = vmul.f32 %v1173_v44, %v952_v19 }
  0xf7   : > { %v968_v62 = vmul.f32 %v1175_v25, %v967_v9 }
  0xf8   : > { %v954_v33 = vadd.f32 %v1173_v44, %v953_v14 }
  0xf9   : > { %v969_v10 = vadd.f32 %v1175_v25, %v968_v62 }
  0xfa   : > { %v958_v2 = vsel %vm957_vm4, %v1173_v44, %v954_v33 }
  0xfb   : > { %v973_v52 = vsel %vm972_vm6, %v1175_v25, %v969_v10  ;;  %v963_v45 = vsel %vm960_vm7, %v962_v60, %v958_v2 }
  0xfc   : > { %v978_v34 = vsel %vm975_vm8, %v977_v43, %v973_v52  ;;  %v980_v47 = vperm.slane %v963_v45, 0 }
  0xfd   : > { %v981_v35 = vperm.slane %v978_v34, 0 }
  0xff   : > { %v984_v36 = vrot.slane %v981_v35, 4 }
 0x101   : > { %v985_v48 = vsel %vm375_vm0, %v980_v47, %v984_v36 }
 0x102   : > { %v987_v30 = vmul.f32 %v985_v48, %v1303_v8 }
 0x104   : > { %988 = vst [vmem:[%s354_s23] sm:$0xff] %v987_v30 }
 0x105 PF: > { %s19_s28 = sadd.s32 1, %s1198_s28   ;;  %s1560_s26 = smov %s1194_s27 }
 0x106   : > { %p16_p5 = scmp.ge.s32.totalorder %s19_s28, 4   ;;  %s1561_s27 = smov %s1563_s6 }
 0x108   :  { %18 = sbr.rel (!%p16_p5) target bundleno = 3 (0x3), region = 81 }

</bundles_post_ra>
